<compile_context>
chip_gen: v7x
topology: tpu7x:2x2x1
jax: 0.10.0
libtpu: 0.0.40
codegen_flags: <defaults>
</compile_context>

<pallas_src>
import functools

import jax
import jax.numpy as jnp
from jax.experimental import pallas as pl
from jax.experimental.pallas import tpu as pltpu


def _layernorm_kernel(x_ref, w_ref, b_ref, o_ref, *, eps, hidden):
    """One row-tile of TF-style LayerNorm; stats over the last (hidden) axis."""
    x = x_ref[...].astype(jnp.float32)                 # (tile_rows, hidden)
    inv_h = jnp.float32(1.0 / hidden)

    # Fused single-pass statistics: E[x] and E[x^2] together, no full-tile
    # centered temporary kept live.
    s1 = jnp.sum(x, axis=-1, keepdims=True)
    s2 = jnp.sum(x * x, axis=-1, keepdims=True)
    u = s1 * inv_h                                     # mean
    var = jnp.maximum(s2 * inv_h - u * u, 0.0)         # biased variance (TF style)
    inv = jax.lax.rsqrt(var + jnp.float32(eps))        # eps inside the sqrt, EUP rsqrt

    w = w_ref[...]                                     # (1, hidden), already f32
    b = b_ref[...]
    o_ref[...] = ((x - u) * inv * w + b).astype(o_ref.dtype)


def _tpu_tuning():
    """Generation-aware VMEM budget / tile-size targets."""
    try:
        kind = jax.devices()[0].device_kind.lower()
    except Exception:
        kind = ""
    if "v7" in kind or "7x" in kind:
        # v7x: 64 MiB physical VMEM per TC, 2 TCs/chip -> conservative budget,
        # and split the row grid across both cores.
        return dict(vmem_limit=48 << 20, block_budget=20 << 20,
                    target_tile=2 << 20, two_core=True)
    if "v5" in kind:
        # v5e: 128 MiB physical VMEM (only the default *scoped* limit is 16 MiB,
        # which we override) -> big tiles are safe and sit near the HBM roofline.
        return dict(vmem_limit=64 << 20, block_budget=32 << 20,
                    target_tile=2 << 20, two_core=False)
    # v6e (or unknown): 128 MiB physical VMEM, plenty of headroom.
    return dict(vmem_limit=96 << 20, block_budget=48 << 20,
                target_tile=4 << 20, two_core=False)


def _choose_tile_rows(rows, hidden, dtype_bytes, target_tile, block_budget, two_core):
    io_row = hidden * dtype_bytes
    # 2x input + 2x output (double buffering) in the I/O dtype, plus ~3 live
    # full-tile f32 intermediates (x_f32, x*x transient, pre-cast output).
    per_row = 4 * io_row + 3 * hidden * 4
    tr = max(target_tile // io_row, 8)
    tr = min(tr, max(block_budget // per_row, 8))
    tr = min(tr, 1024)
    if two_core and rows >= 16:
        # Guarantee >= 2 row-blocks so the "parallel" grid axis can be sharded
        # across both v7x TensorCores.
        half = -(-rows // 2)
        tr = min(tr, ((half + 7) // 8) * 8)
    rows_pad8 = ((rows + 7) // 8) * 8
    tr = min(tr, rows_pad8)                            # keep tiny inputs tiny
    tr = max((tr // 8) * 8, 8)                         # multiple of 8 sublanes
    return int(tr)


def bert_layer_norm(x, weight, bias, eps=1e-12, *, tile_rows=None):
    """x: (..., hidden); weight, bias: (hidden,). Returns same shape/dtype as x."""
    orig_shape = x.shape
    hidden = orig_shape[-1]
    rows = 1
    for d in orig_shape[:-1]:
        rows *= d

    tuning = _tpu_tuning()
    if tile_rows is None:
        tile_rows = _choose_tile_rows(
            rows, hidden, jnp.dtype(x.dtype).itemsize,
            tuning["target_tile"], tuning["block_budget"], tuning["two_core"])
    grid_rows = int(pl.cdiv(rows, tile_rows))

    # No HBM-level padding or output slicing: the reshape is free, the boundary
    # row-block is handled by Pallas (rows are independent, OOB writes masked),
    # and the last block dim equals the full hidden size so non-128-multiple
    # hidden only costs masked partial stores on the last vreg per row.
    x2 = x.reshape(rows, hidden)
    w2 = weight.reshape(1, hidden).astype(jnp.float32)
    b2 = bias.reshape(1, hidden).astype(jnp.float32)

    kernel = functools.partial(_layernorm_kernel, eps=float(eps), hidden=hidden)

    itemsize = jnp.dtype(x.dtype).itemsize
    cost = pl.CostEstimate(
        flops=8 * rows * hidden,
        transcendentals=rows,
        bytes_accessed=2 * rows * hidden * itemsize + 2 * hidden * 4,
    )

    out = pl.pallas_call(
        kernel,
        out_shape=jax.ShapeDtypeStruct((rows, hidden), x.dtype),
        grid_spec=pltpu.PrefetchScalarGridSpec(
            num_scalar_prefetch=0,
            grid=(grid_rows,),
            in_specs=[
                pl.BlockSpec((tile_rows, hidden), lambda i: (i, 0)),
                pl.BlockSpec(memory_space=pltpu.MemorySpace.VMEM),  # weight, whole array
                pl.BlockSpec(memory_space=pltpu.MemorySpace.VMEM),  # bias, whole array
            ],
            out_specs=pl.BlockSpec((tile_rows, hidden), lambda i: (i, 0)),
        ),
        compiler_params=pltpu.CompilerParams(
            dimension_semantics=("parallel",),   # rows independent; lets v7x shard 2 TCs
            vmem_limit_bytes=tuning["vmem_limit"],
        ),
        cost_estimate=cost,
    )(x2, w2, b2)

    return out.reshape(orig_shape)


def _reference(x, weight, bias, eps):
    u = jnp.mean(x, axis=-1, keepdims=True)
    s = jnp.mean((x - u) ** 2, axis=-1, keepdims=True)
    return weight * ((x - u) / jnp.sqrt(s + eps)) + bias


if __name__ == "__main__":
    key = jax.random.PRNGKey(0)
    k1, k2, k3, k4, k5 = jax.random.split(key, 5)

    # Case 1: small BERT-like shape; hidden not a multiple of 128 (masked lane stores).
    batch, seq, hidden = 2, 8, 32
    x = jax.random.normal(k1, (batch, seq, hidden), dtype=jnp.float32)
    weight = 1.0 + 0.1 * jax.random.normal(k2, (hidden,), dtype=jnp.float32)
    bias = 0.1 * jax.random.normal(k3, (hidden,), dtype=jnp.float32)

    y = bert_layer_norm(x, weight, bias, eps=1e-12)
    jax.block_until_ready(y)
    ref = _reference(x, weight, bias, 1e-12)
    assert y.shape == x.shape and y.dtype == x.dtype
    assert jnp.allclose(y, ref, atol=3e-5, rtol=1e-5), "mismatch vs reference (case 1)"

    # Case 2: row count not a multiple of 8 (single partial row-block, no padding).
    x2 = jax.random.normal(k4, (3, 5, 48), dtype=jnp.float32)
    w2 = jnp.ones((48,), dtype=jnp.float32)
    b2 = jnp.zeros((48,), dtype=jnp.float32)
    y2 = bert_layer_norm(x2, w2, b2, eps=1e-12)
    jax.block_until_ready(y2)
    ref2 = _reference(x2, w2, b2, 1e-12)
    assert jnp.allclose(y2, ref2, atol=3e-5, rtol=1e-5), "mismatch vs reference (case 2)"

    # Case 3: multi-block grid with a partial boundary block (rows % tile_rows != 0)
    # and hidden a multiple of 128 (lane-dense fast path). Forces tile_rows=8.
    x3 = jax.random.normal(k5, (15, 128), dtype=jnp.float32)
    w3 = 1.0 + 0.05 * jnp.arange(128, dtype=jnp.float32) / 128.0
    b3 = 0.01 * jnp.arange(128, dtype=jnp.float32)
    y3 = bert_layer_norm(x3, w3, b3, eps=1e-12, tile_rows=8)
    jax.block_until_ready(y3)
    ref3 = _reference(x3, w3, b3, 1e-12)
    assert jnp.allclose(y3, ref3, atol=3e-5, rtol=1e-5), "mismatch vs reference (case 3)"

    print("KERNEL_OK")
</pallas_src>

<mosaic_0001>
module attributes {stable_mosaic.version = 11 : i64} {
  func.func @_layernorm_kernel(%arg0: i32, %arg1: memref<16x32xf32, #tpu.memory_space<vmem>>, %arg2: memref<1x32xf32, #tpu.memory_space<vmem>>, %arg3: memref<1x32xf32, #tpu.memory_space<vmem>>, %arg4: memref<16x32xf32, #tpu.memory_space<vmem>>) attributes {dimension_semantics = [#tpu.dimension_semantics<parallel>], iteration_bounds = array<i64: 1>, scalar_prefetch = 0 : i64, scratch_operands = 0 : i64, tpu.core_type = #tpu.core_type<tc>, window_params = [{transform_indices = @transform_0, window_bounds = array<i64: 16, 32>}, {pipeline_mode = #tpu.pipeline_mode<synchronous>, transform_indices = @transform_1, window_bounds = array<i64: 1, 32>}, {pipeline_mode = #tpu.pipeline_mode<synchronous>, transform_indices = @transform_2, window_bounds = array<i64: 1, 32>}, {transform_indices = @transform_3, window_bounds = array<i64: 16, 32>}]} {
    %c0 = arith.constant 0 : index
    %c0_0 = arith.constant 0 : index
    %0 = vector.load %arg1[%c0, %c0_0] : memref<16x32xf32, #tpu.memory_space<vmem>>, vector<16x32xf32>
    %cst = arith.constant dense<0.000000e+00> : vector<16xf32>
    %1 = vector.multi_reduction <add>, %0, %cst [1] : vector<16x32xf32> to vector<16xf32>
    %2 = vector.shape_cast %1 : vector<16xf32> to vector<16x1xf32>
    %3 = arith.mulf %0, %0 : vector<16x32xf32>
    %cst_1 = arith.constant dense<0.000000e+00> : vector<16xf32>
    %4 = vector.multi_reduction <add>, %3, %cst_1 [1] : vector<16x32xf32> to vector<16xf32>
    %5 = vector.shape_cast %4 : vector<16xf32> to vector<16x1xf32>
    %cst_2 = arith.constant 3.125000e-02 : f32
    %6 = vector.broadcast %cst_2 : f32 to vector<16x1xf32>
    %7 = arith.mulf %2, %6 : vector<16x1xf32>
    %cst_3 = arith.constant 3.125000e-02 : f32
    %8 = vector.broadcast %cst_3 : f32 to vector<16x1xf32>
    %9 = arith.mulf %5, %8 : vector<16x1xf32>
    %10 = arith.mulf %7, %7 : vector<16x1xf32>
    %11 = arith.subf %9, %10 : vector<16x1xf32>
    %cst_4 = arith.constant 0.000000e+00 : f32
    %12 = vector.broadcast %cst_4 : f32 to vector<16x1xf32>
    %13 = arith.maximumf %11, %12 : vector<16x1xf32>
    %cst_5 = arith.constant 9.99999996E-13 : f32
    %14 = vector.broadcast %cst_5 : f32 to vector<16x1xf32>
    %15 = arith.addf %13, %14 : vector<16x1xf32>
    %16 = math.rsqrt %15 : vector<16x1xf32>
    %c0_6 = arith.constant 0 : index
    %c0_7 = arith.constant 0 : index
    %17 = vector.load %arg2[%c0_6, %c0_7] : memref<1x32xf32, #tpu.memory_space<vmem>>, vector<1x32xf32>
    %c0_8 = arith.constant 0 : index
    %c0_9 = arith.constant 0 : index
    %18 = vector.load %arg3[%c0_8, %c0_9] : memref<1x32xf32, #tpu.memory_space<vmem>>, vector<1x32xf32>
    %19 = vector.broadcast %7 : vector<16x1xf32> to vector<16x32xf32>
    %20 = arith.subf %0, %19 : vector<16x32xf32>
    %21 = vector.broadcast %16 : vector<16x1xf32> to vector<16x32xf32>
    %22 = arith.mulf %20, %21 : vector<16x32xf32>
    %23 = vector.broadcast %17 : vector<1x32xf32> to vector<16x32xf32>
    %24 = arith.mulf %22, %23 : vector<16x32xf32>
    %25 = vector.broadcast %18 : vector<1x32xf32> to vector<16x32xf32>
    %26 = arith.addf %24, %25 : vector<16x32xf32>
    %c0_10 = arith.constant 0 : index
    %c0_11 = arith.constant 0 : index
    %27 = vector.load %arg4[%c0_10, %c0_11] : memref<16x32xf32, #tpu.memory_space<vmem>>, vector<16x32xf32>
    tpu.vector_store %arg4[%c0_10, %c0_11], %26 {strides = array<i32>} : memref<16x32xf32, #tpu.memory_space<vmem>>, vector<16x32xf32>,
    return
  }
  func.func @transform_0(%arg0: i32) -> (i32, i32) {
    %c0_i32 = arith.constant 0 : i32
    %c0_i32_0 = arith.constant 0 : i32
    return %arg0, %c0_i32 : i32, i32
  }
  func.func @transform_1(%arg0: i32) -> (i32, i32) {
    %c0_i32 = arith.constant 0 : i32
    %c0_i32_0 = arith.constant 0 : i32
    %c0_i32_1 = arith.constant 0 : i32
    return %c0_i32, %c0_i32_0 : i32, i32
  }
  func.func @transform_2(%arg0: i32) -> (i32, i32) {
    %c0_i32 = arith.constant 0 : i32
    %c0_i32_0 = arith.constant 0 : i32
    %c0_i32_1 = arith.constant 0 : i32
    return %c0_i32, %c0_i32_0 : i32, i32
  }
  func.func @transform_3(%arg0: i32) -> (i32, i32) {
    %c0_i32 = arith.constant 0 : i32
    %c0_i32_0 = arith.constant 0 : i32
    return %arg0, %c0_i32 : i32, i32
  }
}

</mosaic_0001>

<bundles_post_ra>
// kernel: tpu_custom_call.1
= control target key start
LH: loop header
LB: loop body
LE: loop exit
PB: predicated region body
PF: predicated region fallthrough
CT: control target
= control target key end

     0   :  { %8 = vsyncpa [#allocation3], 0  ;;  %s324_s0 = inlined_call_operand.hbm [shape: f32[16,32], index: 0, kind: input, shape index: {}]   ;;  %s325_s1 = inlined_call_operand.hbm [shape: f32[1,32], index: 1, kind: input, shape index: {}]   ;;  %s326_s2 = inlined_call_operand.hbm [shape: f32[1,32], index: 2, kind: input, shape index: {}]   ;;  %s327_s3 = inlined_call_operand.hbm [shape: f32[16,32], index: 3, kind: output, shape index: {}]  }
   0x1   :  { %9 = vsyncpa [#allocation6], 0 }
   0x2   :  { %10 = vsyncpa [#allocation4], 0  ;;  %s231_s12 = smov [#allocation5]   ;;  %s232_s14 = smov [#allocation2]  }
   0x3   :  { %s29_s13 = sshll.u32 %s231_s12, 4  ;;  %s16_s15 = sshll.u32 %s232_s14, 4  ;;  %s30_s13 = int_to_ptr.vmem [resolvable:$true] %s29_s13  ;;  %s257_s15 = int_to_ptr.vmem [resolvable:$true] %s16_s15 }
   0x4   :  { %s137_s18 = scalar_lea.hbm %s325_s1, 16 }
   0x5   :  { %p138_p0 = scmp.ne.s32.totalorder %s325_s1, %s137_s18  ;;  %p141_p1 = scmp.lt.u32.totalorder %s137_s18, %s325_s1 }
   0x7   :  { %p143_p2 = pnand %p141_p1, %p138_p0 }
   0x9   :  { %146 = shalt.err (!%p143_p2)
}
   0xa   :  { %s147_s23 = scalar_lea.vmem %s30_s13, 16  ;;  %s151_s24 = scalar_lea.vmem %s30_s13, 32 }
   0xb   :  { %p148_p3 = scmp.ne.s32.totalorder %s30_s13, %s147_s23  ;;  %p152_p4 = scmp.lt.s32.totalorder %s30_s13, %s30_s13 }
   0xc   :  { %p153_p5 = scmp.lt.s32.totalorder %s151_s24, %s147_s23 }
   0xe   :  { %p154_p6 = por %p153_p5, %p152_p4 }
  0x10   :  { %p155_p7 = pnand %p154_p6, %p148_p3 }
  0x12   :  { %158 = shalt.err (!%p155_p7)
}
  0x13   :  { %32 = dma.hbm_to_vmem [thread:$0]  %s325_s1, 16, %s30_s13, [#allocation6]  }
  0x14   :  { %s159_s29 = scalar_lea.hbm %s324_s0, 256 }
  0x15   :  { %p160_p8 = scmp.ne.s32.totalorder %s324_s0, %s159_s29  ;;  %p163_p9 = scmp.lt.u32.totalorder %s159_s29, %s324_s0 }
  0x17   :  { %p165_p10 = pnand %p163_p9, %p160_p8 }
  0x19   :  { %168 = shalt.err (!%p165_p10)
}
  0x1a   :  { %s169_s7 = scalar_lea.vmem %s257_s15, 256  ;;  %p174_p12 = scmp.lt.s32.totalorder %s257_s15, %s257_s15 }
  0x1b   :  { %p170_p11 = scmp.ne.s32.totalorder %s257_s15, %s169_s7  ;;  %p175_p13 = scmp.lt.s32.totalorder %s169_s7, %s169_s7 }
  0x1d   :  { %p176_p0 = por %p175_p13, %p174_p12 }
  0x1f   :  { %p177_p1 = pnand %p176_p0, %p170_p11 }
  0x21   :  { %180 = shalt.err (!%p177_p1)
}
  0x22   :  { %s233_s1 = smov 128   ;;  %s234_s8 = smov 8  }
  0x23   :  { %22 = dma.hbm_to_vmem [thread:$0]  %s324_s0, 256, %s257_s15, [#allocation3], %s233_s1, %s233_s1, %s234_s8  }
  0x24   :  { %s235_s11 = smov [#allocation7]   ;;  %s181_s16 = scalar_lea.hbm %s326_s2, 16 }
  0x25   :  { %s39_s12 = sshll.u32 %s235_s11, 4  ;;  %p182_p2 = scmp.ne.s32.totalorder %s326_s2, %s181_s16  ;;  %s40_s12 = int_to_ptr.vmem [resolvable:$true] %s39_s12 }
  0x26   :  { %p185_p3 = scmp.lt.u32.totalorder %s181_s16, %s326_s2 }
  0x28   :  { %p187_p4 = pnand %p185_p3, %p182_p2 }
  0x2a   :  { %190 = shalt.err (!%p187_p4)
}
  0x2b   :  { %s191_s21 = scalar_lea.vmem %s40_s12, 16  ;;  %s195_s0 = scalar_lea.vmem %s40_s12, 32 }
  0x2c   :  { %p192_p5 = scmp.ne.s32.totalorder %s40_s12, %s191_s21  ;;  %p196_p6 = scmp.lt.s32.totalorder %s40_s12, %s40_s12 }
  0x2d   :  { %p197_p7 = scmp.lt.s32.totalorder %s195_s0, %s191_s21 }
  0x2f   :  { %p198_p8 = por %p197_p7, %p196_p6 }
  0x31   :  { %p199_p9 = pnand %p198_p8, %p192_p5 }
  0x33   :  { %202 = shalt.err (!%p199_p9)
}
  0x34   :  { %42 = dma.hbm_to_vmem [thread:$0]  %s326_s2, 16, %s40_s12, [#allocation6]  }
  0x35   :  { %225 = dma.done.wait [#allocation3], 256  }
  0x36   :  { %226 = vsyncadd [#allocation3], 4294967040 }
  0x37   :  { %227 = dma.done.wait [#allocation6], 32  }
  0x38   :  { %228 = vsyncadd [#allocation6], 4294967264  ;;  %vm54_vm0 = vcmask 261120   ;;  %v52_v0 = vld [vmem:[#allocation2] sm:$0xff]  ;;  %v53_v1 = vld [vmem:[#allocation2 + $0x8] sm:$0xff]  ;;  %s236_s2 = smov [#allocation8]  }
  0x39   :  { %v55_v2 = vsel %vm54_vm0, %v52_v0, 0.0  ;;  %v61_v3 = vmul.f32 %v52_v0, %v52_v0  ;;  %v62_v4 = vmul.f32 %v53_v1, %v53_v1  ;;  %v58_v6 = vsel %vm54_vm0, %v53_v1, 0.0  ;;  %v125_v26 = vld [vmem:[#allocation5] ss:$0 sm:$0xff]  ;;  %v126_v28 = vld [vmem:[#allocation7] ss:$0 sm:$0xff] }
  0x3a   :  { %56 = vadd.xlane.f32.xlu0 %v55_v2  ;;  %s112_s23 = sshll.u32 %s236_s2, 4  ;;  %s113_s23 = int_to_ptr.vmem [resolvable:$true] %s112_s23 }
  0x3b   :  { %v63_v5 = vsel %vm54_vm0, %v61_v3, 0.0  ;;  %v66_v7 = vsel %vm54_vm0, %v62_v4, 0.0  ;;  %s203_s24 = scalar_lea.vmem %s113_s23, 256  ;;  %p208_p11 = scmp.lt.s32.totalorder %s113_s23, %s113_s23 }
  0x3c   :  { %64 = vadd.xlane.f32.xlu1 %v63_v5  ;;  %p204_p10 = scmp.ne.s32.totalorder %s113_s23, %s203_s24  ;;  %p209_p12 = scmp.lt.s32.totalorder %s203_s24, %s203_s24 }
  0x3e   :  { %59 = vadd.xlane.f32.xlu0 %v58_v6  ;;  %p210_p13 = por %p209_p12, %p208_p11 }
  0x40   :  { %67 = vadd.xlane.f32.xlu1 %v66_v7  ;;  %p211_p0 = pnand %p210_p13, %p204_p10 }
  0xc7   :  { %v57_v8 = vpop.xlane.xlu0 %56 }
  0xc8   :  { %v69_v9 = vmul.f32 0.03125, %v57_v8 }
  0xc9   :  { %v65_v10 = vpop.xlane.xlu1 %64 }
  0xca   :  { %v73_v11 = vmul.f32 %v69_v9, %v69_v9  ;;  %v71_v12 = vmul.f32 0.03125, %v65_v10  ;;  %v85_v24 = vsub.f32 %v52_v0, %v69_v9 }
  0xcb   :  { %v60_v13 = vpop.xlane.xlu0 %59 }
  0xcc   :  { %v75_v14 = vsub.f32 %v71_v12, %v73_v11  ;;  %v70_v15 = vmul.f32 0.03125, %v60_v13 }
  0xcd   :  { %v68_v16 = vpop.xlane.xlu1 %67 }
  0xce   :  { %v77_v17 = vmax.f32 %v75_v14, 0.0  ;;  %v74_v18 = vmul.f32 %v70_v15, %v70_v15  ;;  %v72_v19 = vmul.f32 0.03125, %v68_v16  ;;  %v86_v29 = vsub.f32 %v53_v1, %v70_v15 }
  0xd0   :  { %v79_v20 = vadd.f32 1e-12, %v77_v17  ;;  %v76_v21 = vsub.f32 %v72_v19, %v74_v18 }
  0xd2   :  { %133 = vrsqrt.f32 %v79_v20  ;;  %v78_v22 = vmax.f32 %v76_v21, 0.0 }
  0xd4   :  { %v80_v23 = vadd.f32 1e-12, %v78_v22 }
  0xd6   :  { %135 = vrsqrt.f32 %v80_v23 }
  0xdc   :  { %v134_v25 = vpop.eup %133 }
  0xdd   :  { %v87_v27 = vmul.f32 %v134_v25, %v85_v24 }
  0xdf   :  { %v95_v30 = vmul.f32 %v125_v26, %v87_v27 }
  0xe0   :  { %v136_v31 = vpop.eup %135 }
  0xe1   :  { %v88_v32 = vmul.f32 %v136_v31, %v86_v29  ;;  %v103_v33 = vadd.f32 %v126_v28, %v95_v30 }
  0xe3   :  { %v96_v34 = vmul.f32 %v125_v26, %v88_v32  ;;  %105 = vst.msk [vmem:[#allocation8] sm:$0xff] %vm54_vm0, %v103_v33 }
  0xe5   :  { %v104_v35 = vadd.f32 %v126_v28, %v96_v34 }
  0xe7   :  { %106 = vst.msk [vmem:[#allocation8 + $0x8] sm:$0xff] %vm54_vm0, %v104_v35 }
  0xe8   :  { %214 = shalt.err (!%p211_p0)
}
  0xe9   :  { %s215_s27 = scalar_lea.hbm %s327_s3, 256 }
  0xea   :  { %p216_p1 = scmp.ne.s32.totalorder %s327_s3, %s215_s27  ;;  %p219_p2 = scmp.lt.u32.totalorder %s215_s27, %s327_s3 }
  0xec   :  { %p221_p3 = pnand %p219_p2, %p216_p1 }
  0xee   :  { %224 = shalt.err (!%p221_p3)
}
  0xef   :  { %118 = dma.vmem_to_hbm [thread:$0]  %s113_s23, 256, %s327_s3, [#allocation4], %s233_s1, %s233_s1, %s234_s8  }
  0xf0   :  { %229 = dma.done.wait [#allocation4], 256  }
  0xf1   :  { %230 = vsyncadd [#allocation4], 4294967040 }
  0xf2   :  { %122 = vsyncpa [#allocation3], 1 }
  0xf3   :  { %123 = vsyncpa [#allocation6], 1 }
  0xf4   :  { %124 = vsyncpa [#allocation4], 1 }

</bundles_post_ra>
